<compile_context>
chip_gen: v5e
topology: v5e:2x2
jax: 0.10.0
libtpu: 0.0.40
codegen_flags: <defaults>
</compile_context>

<pallas_src>
import functools

import jax
import jax.numpy as jnp
from jax.experimental import pallas as pl
from jax.experimental.pallas import tpu as pltpu

NEG_SLOPE = 0.01  # torch.nn.LeakyReLU default


def _leaky_relu(x):
    # Single VPU max (vs. compare+select); valid because NEG_SLOPE < 1.
    return jnp.maximum(x, NEG_SLOPE * x)


def _round_up(n, m):
    return ((n + m - 1) // m) * m


def _cdiv(a, b):
    return -(-a // b)


def lifter_res_blocks_kernel(x_ref, w_ref, b_ref, o_ref, *, n_blocks):
    # x_ref: (tb, H)      f32 input tile (streamed)
    # w_ref: (2N, H, H)   bf16 weights in (in,out) layout: [w1_0, w2_0, w1_1, ...]
    # b_ref: (2N, 1, H)   f32 biases:                      [b1_0, b2_0, b1_1, ...]
    # o_ref: (tb, H)      output tile
    h = x_ref[...].astype(jnp.float32)
    for n in range(n_blocks):            # static unroll: fused res blocks
        inp = h
        t = jnp.dot(h.astype(jnp.bfloat16), w_ref[2 * n],
                    preferred_element_type=jnp.float32)
        t = _leaky_relu(t + b_ref[2 * n])
        t = jnp.dot(t.astype(jnp.bfloat16), w_ref[2 * n + 1],
                    preferred_element_type=jnp.float32)
        t = _leaky_relu(t + b_ref[2 * n + 1])
        h = t + inp                       # residual add in f32
    o_ref[...] = h.astype(o_ref.dtype)


def prepare_block_params(w1, b1, w2, b2):
    """One-time prep for ONE res block (model-load time, not per call):
    transpose torch-layout (out,in) weights to (in,out), cast to bf16,
    stack as (2,H,H); biases -> (2,1,H) f32."""
    H = w1.shape[0]
    w = jnp.stack([jnp.asarray(w1).T, jnp.asarray(w2).T]).astype(jnp.bfloat16)
    b = jnp.stack([jnp.asarray(b1), jnp.asarray(b2)]).astype(jnp.float32)
    return w, b.reshape(2, 1, H)


def prepare_stack(blocks):
    """Stack params of several consecutive res blocks for the fused kernel.
    `blocks` is a list of (w1, b1, w2, b2) tuples."""
    ws, bs = zip(*(prepare_block_params(*blk) for blk in blocks))
    return jnp.concatenate(ws, axis=0), jnp.concatenate(bs, axis=0)


@functools.partial(jax.jit, static_argnames=("tb",))
def lifter_res_blocks(x, w_stack, b_stack, *, tb=512):
    """x: (B, H) f32; w_stack: (2N, H, H) bf16 (in,out); b_stack: (2N, 1, H) f32."""
    B, H = x.shape
    n2 = w_stack.shape[0]
    n_blocks = n2 // 2

    # ---- batch-tile selection -------------------------------------------
    # Split B into nsteps nearly-equal tiles (padding capped at a few rows),
    # and force >= 2 grid steps when B is large enough so v7x's two
    # TensorCores both stream HBM (tiles stay >= 128 rows).
    nsteps = max(_cdiv(B, tb), 1)
    if B >= 256:
        nsteps = max(nsteps, 2)
    tb_eff = _round_up(_cdiv(B, nsteps), 8)
    Bp = nsteps * tb_eff
    x_p = x if Bp == B else jnp.pad(x, ((0, Bp - B), (0, 0)))

    flops = n_blocks * 4 * Bp * H * H          # 2 matmuls per block
    bytes_accessed = (2 * Bp * H * 4           # x in + out (f32)
                      + n2 * H * H * 2         # bf16 weights
                      + n2 * H * 4)            # f32 bias rows

    # VMEM budget: streamed x/out (double-buffered) + resident params
    # (default double-buffer), with headroom, clamped for v7x's 64 MiB VMEM.
    streamed = 2 * 2 * tb_eff * H * 4
    resident = 2 * (n2 * H * H * 2 + n2 * H * 4)
    vmem_limit = min(max(32 * 1024 * 1024, int(1.5 * (streamed + resident))),
                     48 * 1024 * 1024)

    kernel = functools.partial(lifter_res_blocks_kernel, n_blocks=n_blocks)

    out = pl.pallas_call(
        kernel,
        out_shape=jax.ShapeDtypeStruct((Bp, H), x.dtype),
        grid_spec=pltpu.PrefetchScalarGridSpec(
            num_scalar_prefetch=0,
            grid=(nsteps,),
            in_specs=[
                pl.BlockSpec((tb_eff, H), lambda i: (i, 0)),      # x tile
                pl.BlockSpec((n2, H, H), lambda i: (0, 0, 0)),    # weights (resident)
                pl.BlockSpec((n2, 1, H), lambda i: (0, 0, 0)),    # biases  (resident)
            ],
            out_specs=pl.BlockSpec((tb_eff, H), lambda i: (i, 0)),
        ),
        compiler_params=pltpu.CompilerParams(
            dimension_semantics=("parallel",),
            vmem_limit_bytes=vmem_limit,
        ),
        cost_estimate=pl.CostEstimate(
            flops=flops, transcendentals=0, bytes_accessed=bytes_accessed),
    )(x_p, w_stack, b_stack)

    return out if Bp == B else out[:B]


def lifter_res_block(x, w_stack, b_stack, *, tb=512):
    """Single res block (the PyTorch module): just the fused kernel with N=1."""
    return lifter_res_blocks(x, w_stack, b_stack, tb=tb)


def _reference_bf16(x, w1, b1, w2, b2):
    """Plain-JAX emulation of the kernel's bf16-weight matmuls (f32 math)."""
    f32 = jnp.float32
    xb = x.astype(jnp.bfloat16).astype(f32)
    w1b = w1.astype(jnp.bfloat16).astype(f32)
    w2b = w2.astype(jnp.bfloat16).astype(f32)
    h = _leaky_relu(xb @ w1b.T + b1)
    h = _leaky_relu(h.astype(jnp.bfloat16).astype(f32) @ w2b.T + b2)
    return h + x


def _reference_f32(x, w1, b1, w2, b2):
    h = _leaky_relu(x @ w1.T + b1)
    h = _leaky_relu(h @ w2.T + b2)
    return h + x


if __name__ == "__main__":
    # Small shapes consistent with the module (hidden shrunk from 1024 -> 256).
    B, H = 16, 256
    key = jax.random.PRNGKey(0)
    kx, kw1, kb1, kw2, kb2, kw3, kb3, kw4, kb4 = jax.random.split(key, 9)

    x = jax.random.normal(kx, (B, H), dtype=jnp.float32)

    # Deterministic "Linear-like" init: U(-1/sqrt(H), 1/sqrt(H)).
    bound = 1.0 / jnp.sqrt(jnp.float32(H))

    def init_linear(kw, kb):
        w = jax.random.uniform(kw, (H, H), jnp.float32, -bound, bound)
        b = jax.random.uniform(kb, (H,), jnp.float32, -bound, bound)
        return w, b

    w1, b1 = init_linear(kw1, kb1)
    w2, b2 = init_linear(kw2, kb2)

    # --- single res block (exactly the PyTorch module) ---------------------
    ws, bs = prepare_block_params(w1, b1, w2, b2)
    out = jax.block_until_ready(lifter_res_block(x, ws, bs))
    assert out.shape == (B, H)

    # Tight check vs. a reference that uses the same bf16-rounded weights.
    ref_bf16 = _reference_bf16(x, w1, b1, w2, b2)
    assert jnp.allclose(out, ref_bf16, atol=2e-3, rtol=2e-3), \
        "mismatch vs bf16-weight reference"

    # Loose check vs. the exact f32 torch semantics (bf16 rounding only).
    ref_f32 = _reference_f32(x, w1, b1, w2, b2)
    assert jnp.allclose(out, ref_f32, atol=5e-2, rtol=5e-2), \
        "mismatch vs f32 reference"

    # --- fused two-block stack (structural optimization from the review) ---
    w3, b3 = init_linear(kw3, kb3)
    w4, b4 = init_linear(kw4, kb4)
    ws2, bs2 = prepare_stack([(w1, b1, w2, b2), (w3, b3, w4, b4)])
    out2 = jax.block_until_ready(lifter_res_blocks(x, ws2, bs2))
    ref2 = _reference_bf16(_reference_bf16(x, w1, b1, w2, b2), w3, b3, w4, b4)
    assert jnp.allclose(out2, ref2, atol=1e-2, rtol=1e-2), \
        "mismatch vs chained bf16 reference (fused blocks)"

    print("KERNEL_OK")
</pallas_src>

<mosaic_0001>
module attributes {stable_mosaic.version = 11 : i64} {
  func.func @lifter_res_blocks_kernel(%arg0: i32, %arg1: memref<16x256xf32, #tpu.memory_space<vmem>>, %arg2: memref<2x256x256xbf16, #tpu.memory_space<vmem>>, %arg3: memref<2x1x256xf32, #tpu.memory_space<vmem>>, %arg4: memref<16x256xf32, #tpu.memory_space<vmem>>) attributes {dimension_semantics = [#tpu.dimension_semantics<parallel>], iteration_bounds = array<i64: 1>, scalar_prefetch = 0 : i64, scratch_operands = 0 : i64, tpu.core_type = #tpu.core_type<tc>, window_params = [{transform_indices = @transform_0, window_bounds = array<i64: 16, 256>}, {pipeline_mode = #tpu.pipeline_mode<synchronous>, transform_indices = @transform_1, window_bounds = array<i64: 2, 256, 256>}, {pipeline_mode = #tpu.pipeline_mode<synchronous>, transform_indices = @transform_2, window_bounds = array<i64: 2, 1, 256>}, {transform_indices = @transform_3, window_bounds = array<i64: 16, 256>}]} {
    %c0 = arith.constant 0 : index
    %c0_0 = arith.constant 0 : index
    %0 = vector.load %arg1[%c0, %c0_0] : memref<16x256xf32, #tpu.memory_space<vmem>>, vector<16x256xf32>
    %1 = arith.truncf %0 : vector<16x256xf32> to vector<16x256xbf16>
    %c0_1 = arith.constant 0 : index
    %c0_2 = arith.constant 0 : index
    %c0_3 = arith.constant 0 : index
    %2 = vector.load %arg2[%c0_1, %c0_2, %c0_3] : memref<2x256x256xbf16, #tpu.memory_space<vmem>>, vector<1x256x256xbf16>
    %3 = vector.shape_cast %2 : vector<1x256x256xbf16> to vector<256x256xbf16>
    %cst = arith.constant dense<0.000000e+00> : vector<16x256xf32>
    %4 = tpu.matmul %1, %3, %cst {dimension_numbers = #tpu.dot_dimension_numbers<[1], [0], [0], [1], [0, 0, 1, 1], [], []>} : vector<16x256xbf16>, vector<256x256xbf16>, vector<16x256xf32> -> vector<16x256xf32>
    %c0_4 = arith.constant 0 : index
    %c0_5 = arith.constant 0 : index
    %c0_6 = arith.constant 0 : index
    %5 = vector.load %arg3[%c0_4, %c0_5, %c0_6] : memref<2x1x256xf32, #tpu.memory_space<vmem>>, vector<1x1x256xf32>
    %6 = vector.shape_cast %5 : vector<1x1x256xf32> to vector<1x256xf32>
    %7 = vector.broadcast %6 : vector<1x256xf32> to vector<16x256xf32>
    %8 = arith.addf %4, %7 : vector<16x256xf32>
    %cst_7 = arith.constant 0.00999999977 : f32
    %9 = vector.broadcast %cst_7 : f32 to vector<16x256xf32>
    %10 = arith.mulf %9, %8 : vector<16x256xf32>
    %11 = arith.maximumf %8, %10 : vector<16x256xf32>
    %12 = arith.truncf %11 : vector<16x256xf32> to vector<16x256xbf16>
    %c1 = arith.constant 1 : index
    %c0_8 = arith.constant 0 : index
    %c0_9 = arith.constant 0 : index
    %13 = vector.load %arg2[%c1, %c0_8, %c0_9] : memref<2x256x256xbf16, #tpu.memory_space<vmem>>, vector<1x256x256xbf16>
    %14 = vector.shape_cast %13 : vector<1x256x256xbf16> to vector<256x256xbf16>
    %cst_10 = arith.constant dense<0.000000e+00> : vector<16x256xf32>
    %15 = tpu.matmul %12, %14, %cst_10 {dimension_numbers = #tpu.dot_dimension_numbers<[1], [0], [0], [1], [0, 0, 1, 1], [], []>} : vector<16x256xbf16>, vector<256x256xbf16>, vector<16x256xf32> -> vector<16x256xf32>
    %c1_11 = arith.constant 1 : index
    %c0_12 = arith.constant 0 : index
    %c0_13 = arith.constant 0 : index
    %16 = vector.load %arg3[%c1_11, %c0_12, %c0_13] : memref<2x1x256xf32, #tpu.memory_space<vmem>>, vector<1x1x256xf32>
    %17 = vector.shape_cast %16 : vector<1x1x256xf32> to vector<1x256xf32>
    %18 = vector.broadcast %17 : vector<1x256xf32> to vector<16x256xf32>
    %19 = arith.addf %15, %18 : vector<16x256xf32>
    %cst_14 = arith.constant 0.00999999977 : f32
    %20 = vector.broadcast %cst_14 : f32 to vector<16x256xf32>
    %21 = arith.mulf %20, %19 : vector<16x256xf32>
    %22 = arith.maximumf %19, %21 : vector<16x256xf32>
    %23 = arith.addf %22, %0 : vector<16x256xf32>
    %c0_15 = arith.constant 0 : index
    %c0_16 = arith.constant 0 : index
    %24 = vector.load %arg4[%c0_15, %c0_16] : memref<16x256xf32, #tpu.memory_space<vmem>>, vector<16x256xf32>
    tpu.vector_store %arg4[%c0_15, %c0_16], %23 {strides = array<i32>} : memref<16x256xf32, #tpu.memory_space<vmem>>, vector<16x256xf32>,
    return
  }
  func.func @transform_0(%arg0: i32) -> (i32, i32) {
    %c0_i32 = arith.constant 0 : i32
    %c0_i32_0 = arith.constant 0 : i32
    return %arg0, %c0_i32 : i32, i32
  }
  func.func @transform_1(%arg0: i32) -> (i32, i32, i32) {
    %c0_i32 = arith.constant 0 : i32
    %c0_i32_0 = arith.constant 0 : i32
    %c0_i32_1 = arith.constant 0 : i32
    %c0_i32_2 = arith.constant 0 : i32
    return %c0_i32, %c0_i32_0, %c0_i32_1 : i32, i32, i32
  }
  func.func @transform_2(%arg0: i32) -> (i32, i32, i32) {
    %c0_i32 = arith.constant 0 : i32
    %c0_i32_0 = arith.constant 0 : i32
    %c0_i32_1 = arith.constant 0 : i32
    %c0_i32_2 = arith.constant 0 : i32
    return %c0_i32, %c0_i32_0, %c0_i32_1 : i32, i32, i32
  }
  func.func @transform_3(%arg0: i32) -> (i32, i32) {
    %c0_i32 = arith.constant 0 : i32
    %c0_i32_0 = arith.constant 0 : i32
    return %arg0, %c0_i32 : i32, i32
  }
}

</mosaic_0001>

<bundles_post_ra>
// kernel: lifter_res_blocks.1
= control target key start
LH: loop header
LB: loop body
LE: loop exit
PB: predicated region body
PF: predicated region fallthrough
CT: control target
= control target key end

     0   :  { %8 = vsyncpa [#allocation3], 0  ;;  %s1120_s0 = inlined_call_operand.hbm [shape: f32[16,256], index: 0, kind: input, shape index: {}]   ;;  %s1121_s1 = inlined_call_operand.hbm [shape: bf16[2,256,256], index: 1, kind: input, shape index: {}]   ;;  %s1122_s2 = inlined_call_operand.hbm [shape: f32[2,1,256], index: 2, kind: input, shape index: {}]   ;;  %s1123_s3 = inlined_call_operand.hbm [shape: f32[16,256], index: 3, kind: output, shape index: {}]  }
   0x1   :  { %9 = vsyncpa [#allocation6], 0  ;;  %s28_s14 = sshll.u32 %s1121_s1, 4  ;;  %s29_s14 = int_to_ptr.hbm [resolvable:$true] %s28_s14 }
   0x2   :  { %10 = vsyncpa [#allocation4], 0  ;;  %s1056_s15 = smov [#allocation5]   ;;  %s15_s19 = sshll.u32 %s1120_s0, 4  ;;  %s16_s19 = int_to_ptr.hbm [resolvable:$true] %s15_s19 }
   0x3   :  { %s30_s16 = sshll.u32 %s1056_s15, 4  ;;  %s1057_s20 = smov 128   ;;  %s31_s16 = int_to_ptr.vmem [resolvable:$true] %s30_s16 }
   0x4   :  { %s1058_s21 = smov 8   ;;  %s1059_s22 = smov [#allocation2]  }
   0x5   :  { %36 = dma.hbm_to_vmem [thread:$0]  %s29_s14, 8192, %s31_s16, [#allocation6], %s1057_s20, %s1057_s20, %s1058_s21  }
   0x6   :  { %s17_s23 = sshll.u32 %s1059_s22, 4  ;;  %s1060_s24 = smov 256   ;;  %s18_s23 = int_to_ptr.vmem [resolvable:$true] %s17_s23 }
   0x7   :  { %s1061_s25 = smov 16   ;;  %s41_s27 = sshll.u32 %s1122_s2, 4  ;;  %s42_s27 = int_to_ptr.hbm [resolvable:$true] %s41_s27 }
   0x8   :  { %23 = dma.hbm_to_vmem [thread:$0]  %s16_s19, 512, %s18_s23, [#allocation3], %s1060_s24, %s1060_s24, %s1061_s25  }
   0x9   :  { %s1062_s28 = smov [#allocation7]   ;;  %s1063_s29 = smov 32  }
   0xa   :  { %s43_s0 = sshll.u32 %s1062_s28, 4  ;;  %s1064_s30 = smov 2   ;;  %s44_s0 = int_to_ptr.vmem [resolvable:$true] %s43_s0 }
   0xb   :  { %49 = dma.hbm_to_vmem [thread:$0]  %s42_s27, 64, %s44_s0, [#allocation6], %s1063_s29, %s1063_s29, %s1064_s30  }
   0xc   :  { %1050 = dma.done.wait [#allocation3], 512  }
   0xd   :  { %1051 = vsyncadd [#allocation3], 4294966784 }
   0xe   :  { %1052 = dma.done.wait [#allocation6], 8256  }
   0xf   :  { %1053 = vsyncadd [#allocation6], 4294959040  ;;  %v682_v0 = vld [vmem:[#allocation5 + $0x70] sm:$0xf]  ;;  %v895_v1 = vld [vmem:[#allocation5 + $0x74] sm:$0xf0] }
  0x10   :  { %v746_v2 = vld [vmem:[#allocation5 + $0xf0] sm:$0xf]  ;;  %v683_v3 = vor.u32 %v895_v1, %v682_v0  ;;  %v911_v4 = vld [vmem:[#allocation5 + $0xf4] sm:$0xf0]  ;;  %v894_v5 = vld [vmem:[#allocation5 + $0x74] sm:$0xf] }
  0x11   :  { %v684_v6 = vld [vmem:[#allocation5 + $0x78] sm:$0xf0]  ;;  %v747_v7 = vor.u32 %v911_v4, %v746_v2  ;;  %v910_v9 = vld [vmem:[#allocation5 + $0xf4] sm:$0xf]  ;;  %v674_v11 = vld [vmem:[#allocation5 + $0x60] sm:$0xf] }
  0x12   :  { %v687_v8 = vor.u32 %v894_v5, %v684_v6  ;;  %v748_v10 = vld [vmem:[#allocation5 + $0xf8] sm:$0xf0]  ;;  %266 = vmatpush.bf16.msra.mxu0 %v683_v3  ;;  %v893_v13 = vld [vmem:[#allocation5 + $0x64] sm:$0xf0]  ;;  %v738_v14 = vld [vmem:[#allocation5 + $0xe0] sm:$0xf] }
  0x13   :  { %v751_v12 = vor.u32 %v910_v9, %v748_v10  ;;  %v909_v15 = vld [vmem:[#allocation5 + $0xe4] sm:$0xf0]  ;;  %280 = vmatpush.bf16.msra.mxu1 %v747_v7  ;;  %v675_v16 = vor.u32 %v893_v13, %v674_v11  ;;  %v892_v18 = vld [vmem:[#allocation5 + $0x64] sm:$0xf]  ;;  %v676_v19 = vld [vmem:[#allocation5 + $0x68] sm:$0xf0] }
  0x14   :  { %294 = vmatpush.bf16.msra.mxu2 %v687_v8  ;;  %v739_v17 = vor.u32 %v909_v15, %v738_v14  ;;  %v908_v20 = vld [vmem:[#allocation5 + $0xe4] sm:$0xf]  ;;  %v679_v21 = vor.u32 %v892_v18, %v676_v19  ;;  %v740_v22 = vld [vmem:[#allocation5 + $0xe8] sm:$0xf0]  ;;  %v666_v23 = vld [vmem:[#allocation5 + $0x50] sm:$0xf] }
  0x15   :  { %308 = vmatpush.bf16.msra.mxu3 %v751_v12  ;;  %v891_v24 = vld [vmem:[#allocation5 + $0x54] sm:$0xf0]  ;;  %v743_v25 = vor.u32 %v908_v20, %v740_v22  ;;  %v730_v26 = vld [vmem:[#allocation5 + $0xd0] sm:$0xf]  ;;  %v890_v28 = vld [vmem:[#allocation5 + $0x54] sm:$0xf] }
  0x16   :  { %v907_v27 = vld [vmem:[#allocation5 + $0xd4] sm:$0xf0]  ;;  %267 = vmatpush.bf16.msra.mxu0 %v675_v16  ;;  %v667_v29 = vor.u32 %v891_v24, %v666_v23  ;;  %v668_v30 = vld [vmem:[#allocation5 + $0x58] sm:$0xf0]  ;;  %v906_v31 = vld [vmem:[#allocation5 + $0xd4] sm:$0xf] }
  0x17   :  { %v732_v32 = vld [vmem:[#allocation5 + $0xd8] sm:$0xf0]  ;;  %281 = vmatpush.bf16.msra.mxu1 %v739_v17  ;;  %v731_v33 = vor.u32 %v907_v27, %v730_v26  ;;  %v671_v34 = vor.u32 %v890_v28, %v668_v30  ;;  %v658_v35 = vld [vmem:[#allocation5 + $0x40] sm:$0xf]  ;;  %v889_v36 = vld [vmem:[#allocation5 + $0x44] sm:$0xf0] }
  0x18   :  { %295 = vmatpush.bf16.msra.mxu2 %v679_v21  ;;  %v722_v37 = vld [vmem:[#allocation5 + $0xc0] sm:$0xf]  ;;  %v735_v38 = vor.u32 %v906_v31, %v732_v32  ;;  %v905_v39 = vld [vmem:[#allocation5 + $0xc4] sm:$0xf0]  ;;  %v888_v40 = vld [vmem:[#allocation5 + $0x44] sm:$0xf]  ;;  %v659_v44 = vor.u32 %v889_v36, %v658_v35 }
  0x19   :  { %309 = vmatpush.bf16.msra.mxu3 %v743_v25  ;;  %v660_v41 = vld [vmem:[#allocation5 + $0x48] sm:$0xf0]  ;;  %v904_v42 = vld [vmem:[#allocation5 + $0xc4] sm:$0xf]  ;;  %v723_v45 = vor.u32 %v905_v39, %v722_v37  ;;  %v650_v47 = vld [vmem:[#allocation5 + $0x30] sm:$0xf] }
  0x1a   :  { %v724_v43 = vld [vmem:[#allocation5 + $0xc8] sm:$0xf0]  ;;  %268 = vmatpush.bf16.msra.mxu0 %v667_v29  ;;  %v663_v46 = vor.u32 %v888_v40, %v660_v41  ;;  %v887_v48 = vld [vmem:[#allocation5 + $0x34] sm:$0xf0]  ;;  %v714_v49 = vld [vmem:[#allocation5 + $0xb0] sm:$0xf] }
  0x1b   :  { %282 = vmatpush.bf16.msra.mxu1 %v731_v33  ;;  %v727_v50 = vor.u32 %v904_v42, %v724_v43  ;;  %v903_v51 = vld [vmem:[#allocation5 + $0xb4] sm:$0xf0]  ;;  %v886_v52 = vld [vmem:[#allocation5 + $0x34] sm:$0xf]  ;;  %v652_v53 = vld [vmem:[#allocation5 + $0x38] sm:$0xf0]  ;;  %v651_v56 = vor.u32 %v887_v48, %v650_v47 }
  0x1c   :  { %296 = vmatpush.bf16.msra.mxu2 %v671_v34  ;;  %v902_v54 = vld [vmem:[#allocation5 + $0xb4] sm:$0xf]  ;;  %v716_v55 = vld [vmem:[#allocation5 + $0xb8] sm:$0xf0]  ;;  %v715_v57 = vor.u32 %v903_v51, %v714_v49  ;;  %v655_v58 = vor.u32 %v886_v52, %v652_v53  ;;  %v642_v59 = vld [vmem:[#allocation5 + $0x20] sm:$0xf] }
  0x1d   :  { %310 = vmatpush.bf16.msra.mxu3 %v735_v38  ;;  %v885_v60 = vld [vmem:[#allocation5 + $0x24] sm:$0xf0]  ;;  %v706_v61 = vld [vmem:[#allocation5 + $0xa0] sm:$0xf]  ;;  %v719_v62 = vor.u32 %v902_v54, %v716_v55  ;;  %v884_v0 = vld [vmem:[#allocation5 + $0x24] sm:$0xf] }
  0x1e   :  { %269 = vmatpush.bf16.msra.mxu0 %v659_v44  ;;  %v901_v63 = vld [vmem:[#allocation5 + $0xa4] sm:$0xf0]  ;;  %v644_v1 = vld [vmem:[#allocation5 + $0x28] sm:$0xf0]  ;;  %v900_v2 = vld [vmem:[#allocation5 + $0xa4] sm:$0xf]  ;;  %v643_v4 = vor.u32 %v885_v60, %v642_v59 }
  0x1f   :  { %283 = vmatpush.bf16.msra.mxu1 %v723_v45  ;;  %v708_v3 = vld [vmem:[#allocation5 + $0xa8] sm:$0xf0]  ;;  %v707_v5 = vor.u32 %v901_v63, %v706_v61  ;;  %v647_v6 = vor.u32 %v884_v0, %v644_v1  ;;  %v634_v7 = vld [vmem:[#allocation5 + $0x10] sm:$0xf]  ;;  %v883_v8 = vld [vmem:[#allocation5 + $0x14] sm:$0xf0] }
  0x20   :  { %297 = vmatpush.bf16.msra.mxu2 %v663_v46  ;;  %v698_v9 = vld [vmem:[#allocation5 + $0x90] sm:$0xf]  ;;  %v711_v10 = vor.u32 %v900_v2, %v708_v3  ;;  %v899_v11 = vld [vmem:[#allocation5 + $0x94] sm:$0xf0]  ;;  %v882_v12 = vld [vmem:[#allocation5 + $0x14] sm:$0xf]  ;;  %v635_v16 = vor.u32 %v883_v8, %v634_v7 }
  0x21   :  { %311 = vmatpush.bf16.msra.mxu3 %v727_v50  ;;  %v636_v13 = vld [vmem:[#allocation5 + $0x18] sm:$0xf0]  ;;  %v898_v14 = vld [vmem:[#allocation5 + $0x94] sm:$0xf]  ;;  %v626_v17 = vld [vmem:[#allocation5] sm:$0xf]  ;;  %v699_v19 = vor.u32 %v899_v11, %v698_v9 }
  0x22   :  { %270 = vmatpush.bf16.msra.mxu0 %v651_v56  ;;  %v700_v15 = vld [vmem:[#allocation5 + $0x98] sm:$0xf0]  ;;  %v881_v18 = vld [vmem:[#allocation5 + $0x4] sm:$0xf0]  ;;  %v639_v20 = vor.u32 %v882_v12, %v636_v13  ;;  %v690_v21 = vld [vmem:[#allocation5 + $0x80] sm:$0xf] }
  0x23   :  { %284 = vmatpush.bf16.msra.mxu1 %v715_v57  ;;  %v897_v22 = vld [vmem:[#allocation5 + $0x84] sm:$0xf0]  ;;  %v880_v23 = vld [vmem:[#allocation5 + $0x4] sm:$0xf]  ;;  %v703_v24 = vor.u32 %v898_v14, %v700_v15  ;;  %v628_v25 = vld [vmem:[#allocation5 + $0x8] sm:$0xf0]  ;;  %v627_v31 = vor.u32 %v881_v18, %v626_v17 }
  0x24   :  { %298 = vmatpush.bf16.msra.mxu2 %v655_v58  ;;  %v896_v26 = vld [vmem:[#allocation5 + $0x84] sm:$0xf]  ;;  %v692_v27 = vld [vmem:[#allocation5 + $0x88] sm:$0xf0]  ;;  %v810_v29 = vld [vmem:[#allocation5 + $0x170] sm:$0xf]  ;;  %v691_v35 = vor.u32 %v897_v22, %v690_v21  ;;  %v631_v36 = vor.u32 %v880_v23, %v628_v25 }
  0x25   :  { %312 = vmatpush.bf16.msra.mxu3 %v719_v62  ;;  %v1098_v28 = vld [vmem:[#allocation2] sm:$0xff]  ;;  %v927_v30 = vld [vmem:[#allocation5 + $0x174] sm:$0xf0]  ;;  %v1100_v32 = vld [vmem:[#allocation2 + $0x10] sm:$0xff]  ;;  %v695_v39 = vor.u32 %v896_v26, %v692_v27  ;;  %s1065_s2 = smov [#allocation8]   ;;  %s610_s7 = sshll.u32 %s1123_s3, 4  ;;  %s611_s7 = int_to_ptr.hbm [resolvable:$true] %s610_s7 }
  0x26   :  { %271 = vmatpush.bf16.msra.mxu0 %v643_v4  ;;  %v926_v33 = vld [vmem:[#allocation5 + $0x174] sm:$0xf]  ;;  %v812_v34 = vld [vmem:[#allocation5 + $0x178] sm:$0xf0]  ;;  %v1102_v37 = vld [vmem:[#allocation2 + $0x8] sm:$0xff]  ;;  %v811_v40 = vor.u32 %v927_v30, %v810_v29  ;;  %v66_v44 = vpack.c.bf16 %v1100_v32, %v1098_v28  ;;  %s608_s4 = sshll.u32 %s1065_s2, 4  ;;  %s609_s4 = int_to_ptr.vmem [resolvable:$true] %s608_s4 }
  0x27   :  { %285 = vmatpush.bf16.msra.mxu1 %v707_v5  ;;  %v1104_v38 = vld [vmem:[#allocation2 + $0x18] sm:$0xff]  ;;  %v802_v41 = vld [vmem:[#allocation5 + $0x160] sm:$0xf]  ;;  %v874_v42 = vld [vmem:[#allocation5 + $0x1f0] sm:$0xf]  ;;  %v815_v45 = vor.u32 %v926_v33, %v812_v34 }
  0x28   :  { %299 = vmatpush.bf16.msra.mxu2 %v647_v6  ;;  %v943_v43 = vld [vmem:[#allocation5 + $0x1f4] sm:$0xf0]  ;;  %v925_v46 = vld [vmem:[#allocation5 + $0x164] sm:$0xf0]  ;;  %v942_v47 = vld [vmem:[#allocation5 + $0x1f4] sm:$0xf]  ;;  %v67_v49 = vpack.c.bf16 %v1104_v38, %v1102_v37 }
  0x29   :  { %313 = vmatpush.bf16.msra.mxu3 %v711_v10  ;;  %v876_v48 = vld [vmem:[#allocation5 + $0x1f8] sm:$0xf0]  ;;  %v924_v50 = vld [vmem:[#allocation5 + $0x164] sm:$0xf]  ;;  %v804_v51 = vld [vmem:[#allocation5 + $0x168] sm:$0xf0]  ;;  %v875_v52 = vor.u32 %v943_v43, %v874_v42  ;;  %v803_v53 = vor.u32 %v925_v46, %v802_v41 }
  0x2a   :  { %272 = vmatpush.bf16.msra.mxu0 %v635_v16  ;;  %v879_v54 = vor.u32 %v942_v47, %v876_v48  ;;  %v794_v55 = vld [vmem:[#allocation5 + $0x150] sm:$0xf]  ;;  %v866_v56 = vld [vmem:[#allocation5 + $0x1e0] sm:$0xf]  ;;  %v941_v57 = vld [vmem:[#allocation5 + $0x1e4] sm:$0xf0]  ;;  %v807_v58 = vor.u32 %v924_v50, %v804_v51 }
  0x2b   :  { %286 = vmatpush.bf16.msra.mxu1 %v699_v19  ;;  %v923_v59 = vld [vmem:[#allocation5 + $0x154] sm:$0xf0]  ;;  %v940_v60 = vld [vmem:[#allocation5 + $0x1e4] sm:$0xf]  ;;  %v868_v61 = vld [vmem:[#allocation5 + $0x1e8] sm:$0xf0]  ;;  %v867_v0 = vor.u32 %v941_v57, %v866_v56 }
  0x2c   :  { %300 = vmatpush.bf16.msra.mxu2 %v639_v20  ;;  %v922_v62 = vld [vmem:[#allocation5 + $0x154] sm:$0xf]  ;;  %v796_v63 = vld [vmem:[#allocation5 + $0x158] sm:$0xf0]  ;;  %v795_v1 = vor.u32 %v923_v59, %v794_v55  ;;  %v871_v2 = vor.u32 %v940_v60, %v868_v61  ;;  %v786_v4 = vld [vmem:[#allocation5 + $0x140] sm:$0xf] }
  0x2d   :  { %314 = vmatpush.bf16.msra.mxu3 %v703_v24  ;;  %v799_v3 = vor.u32 %v922_v62, %v796_v63  ;;  %v921_v5 = vld [vmem:[#allocation5 + $0x144] sm:$0xf0]  ;;  %v920_v6 = vld [vmem:[#allocation5 + $0x144] sm:$0xf]  ;;  %v788_v8 = vld [vmem:[#allocation5 + $0x148] sm:$0xf0] }
  0x2e   :  { %273 = vmatpush.bf16.msra.mxu0 %v627_v31  ;;  %v787_v7 = vor.u32 %v921_v5, %v786_v4  ;;  %v791_v9 = vor.u32 %v920_v6, %v788_v8  ;;  %v858_v10 = vld [vmem:[#allocation5 + $0x1d0] sm:$0xf]  ;;  %v939_v11 = vld [vmem:[#allocation5 + $0x1d4] sm:$0xf0]  ;;  %v938_v12 = vld [vmem:[#allocation5 + $0x1d4] sm:$0xf] }
  0x2f   :  { %287 = vmatpush.bf16.msra.mxu1 %v691_v35  ;;  %v859_v13 = vor.u32 %v939_v11, %v858_v10  ;;  %v860_v14 = vld [vmem:[#allocation5 + $0x1d8] sm:$0xf0]  ;;  %v778_v16 = vld [vmem:[#allocation5 + $0x130] sm:$0xf]  ;;  %v919_v17 = vld [vmem:[#allocation5 + $0x134] sm:$0xf0] }
  0x30   :  { %301 = vmatpush.bf16.msra.mxu2 %v631_v36  ;;  %v863_v15 = vor.u32 %v938_v12, %v860_v14  ;;  %v918_v18 = vld [vmem:[#allocation5 + $0x134] sm:$0xf]  ;;  %v779_v19 = vor.u32 %v919_v17, %v778_v16  ;;  %v780_v20 = vld [vmem:[#allocation5 + $0x138] sm:$0xf0]  ;;  %v850_v22 = vld [vmem:[#allocation5 + $0x1c0] sm:$0xf] }
  0x31   :  { %315 = vmatpush.bf16.msra.mxu3 %v695_v39  ;;  %274 = vmatmul.bf16.vlgmr.msra.gmra.mxu0 %v66_v44  ;;  %v783_v21 = vor.u32 %v918_v18, %v780_v20  ;;  %v937_v23 = vld [vmem:[#allocation5 + $0x1c4] sm:$0xf0]  ;;  %v936_v24 = vld [vmem:[#allocation5 + $0x1c4] sm:$0xf]  ;;  %v852_v26 = vld [vmem:[#allocation5 + $0x1c8] sm:$0xf0] }
  0x32   :  { %532 = vmatpush.bf16.msrb.mxu0 %v811_v40  ;;  %288 = vmatmul.bf16.vlgmr.msra.gmra.mxu1 %v67_v49  ;;  %v851_v25 = vor.u32 %v937_v23, %v850_v22  ;;  %v855_v27 = vor.u32 %v936_v24, %v852_v26  ;;  %v770_v29 = vld [vmem:[#allocation5 + $0x120] sm:$0xf]  ;;  %v917_v30 = vld [vmem:[#allocation5 + $0x124] sm:$0xf0]  ;;  %v916_v33 = vld [vmem:[#allocation5 + $0x124] sm:$0xf] }
  0x33   :  { %302 = vmatmul.bf16.vlgmr.msra.gmra.mxu2 %v66_v44  ;;  %546 = vmatpush.bf16.msrb.mxu1 %v875_v52  ;;  %v771_v31 = vor.u32 %v917_v30, %v770_v29  ;;  %v772_v34 = vld [vmem:[#allocation5 + $0x128] sm:$0xf0]  ;;  %v842_v36 = vld [vmem:[#allocation5 + $0x1b0] sm:$0xf]  ;;  %v935_v39 = vld [vmem:[#allocation5 + $0x1b4] sm:$0xf0] }
  0x34   :  { %560 = vmatpush.bf16.msrb.mxu2 %v815_v45  ;;  %316 = vmatmul.bf16.vlgmr.msra.gmra.mxu3 %v67_v49  ;;  %v775_v35 = vor.u32 %v916_v33, %v772_v34  ;;  %v934_v40 = vld [vmem:[#allocation5 + $0x1b4] sm:$0xf]  ;;  %v843_v41 = vor.u32 %v935_v39, %v842_v36  ;;  %v844_v42 = vld [vmem:[#allocation5 + $0x1b8] sm:$0xf0]  ;;  %v762_v44 = vld [vmem:[#allocation5 + $0x110] sm:$0xf] }
  0x35   :  { %574 = vmatpush.bf16.msrb.mxu3 %v879_v54  ;;  %v847_v43 = vor.u32 %v934_v40, %v844_v42  ;;  %v915_v45 = vld [vmem:[#allocation5 + $0x114] sm:$0xf0]  ;;  %v914_v46 = vld [vmem:[#allocation5 + $0x114] sm:$0xf]  ;;  %v764_v48 = vld [vmem:[#allocation5 + $0x118] sm:$0xf0] }
  0x36   :  { %533 = vmatpush.bf16.msrb.mxu0 %v803_v53  ;;  %v763_v47 = vor.u32 %v915_v45, %v762_v44  ;;  %v767_v49 = vor.u32 %v914_v46, %v764_v48  ;;  %v834_v50 = vld [vmem:[#allocation5 + $0x1a0] sm:$0xf]  ;;  %v933_v51 = vld [vmem:[#allocation5 + $0x1a4] sm:$0xf0]  ;;  %v932_v52 = vld [vmem:[#allocation5 + $0x1a4] sm:$0xf] }
  0x37   :  { %547 = vmatpush.bf16.msrb.mxu1 %v867_v0  ;;  %v835_v53 = vor.u32 %v933_v51, %v834_v50  ;;  %v836_v54 = vld [vmem:[#allocation5 + $0x1a8] sm:$0xf0]  ;;  %v754_v56 = vld [vmem:[#allocation5 + $0x100] sm:$0xf]  ;;  %v913_v57 = vld [vmem:[#allocation5 + $0x104] sm:$0xf0] }
  0x38   :  { %561 = vmatpush.bf16.msrb.mxu2 %v807_v58  ;;  %v839_v55 = vor.u32 %v932_v52, %v836_v54  ;;  %v912_v58 = vld [vmem:[#allocation5 + $0x104] sm:$0xf]  ;;  %v755_v59 = vor.u32 %v913_v57, %v754_v56  ;;  %v756_v60 = vld [vmem:[#allocation5 + $0x108] sm:$0xf0]  ;;  %v826_v62 = vld [vmem:[#allocation5 + $0x190] sm:$0xf] }
  0x39   :  { %575 = vmatpush.bf16.msrb.mxu3 %v871_v2  ;;  %v759_v61 = vor.u32 %v912_v58, %v756_v60  ;;  %v931_v63 = vld [vmem:[#allocation5 + $0x194] sm:$0xf0]  ;;  %v930_v0 = vld [vmem:[#allocation5 + $0x194] sm:$0xf]  ;;  %v828_v2 = vld [vmem:[#allocation5 + $0x198] sm:$0xf0] }
  0x3a   :  { %534 = vmatpush.bf16.msrb.mxu0 %v795_v1  ;;  %v827_v1 = vor.u32 %v931_v63, %v826_v62  ;;  %v818_v4 = vld [vmem:[#allocation5 + $0x180] sm:$0xf]  ;;  %v929_v5 = vld [vmem:[#allocation5 + $0x184] sm:$0xf0]  ;;  %v928_v6 = vld [vmem:[#allocation5 + $0x184] sm:$0xf] }
  0x3b   :  { %548 = vmatpush.bf16.msrb.mxu1 %v859_v13  ;;  %v820_v8 = vld [vmem:[#allocation5 + $0x188] sm:$0xf0]  ;;  %v100_v10 = vld [vmem:[#allocation7] sm:$0x3] }
  0x3c   :  { %562 = vmatpush.bf16.msrb.mxu2 %v799_v3  ;;  %v831_v3 = vor.u32 %v930_v0, %v828_v2  ;;  %v102_v11 = vperm.slane %v100_v10, 0 }
  0x3d   :  { %576 = vmatpush.bf16.msrb.mxu3 %v863_v15  ;;  %v103_v15 = vperm.slane %v100_v10, 1 }
  0x3e   :  { %535 = vmatpush.bf16.msrb.mxu0 %v787_v7  ;;  %v819_v7 = vor.u32 %v929_v5, %v818_v4 }
  0x3f   :  { %549 = vmatpush.bf16.msrb.mxu1 %v851_v25 }
  0x40   :  { %563 = vmatpush.bf16.msrb.mxu2 %v791_v9  ;;  %v823_v9 = vor.u32 %v928_v6, %v820_v8 }
  0x41   :  { %577 = vmatpush.bf16.msrb.mxu3 %v855_v27 }
  0x42   :  { %536 = vmatpush.bf16.msrb.mxu0 %v779_v19 }
  0x43   :  { %550 = vmatpush.bf16.msrb.mxu1 %v843_v41 }
  0x44   :  { %564 = vmatpush.bf16.msrb.mxu2 %v783_v21 }
  0x45   :  { %578 = vmatpush.bf16.msrb.mxu3 %v847_v43  ;;  %v366_v43 = vld [vmem:[#allocation7 + $0x2] sm:$0x3] }
  0x46   :  { %537 = vmatpush.bf16.msrb.mxu0 %v771_v31  ;;  %v368_v45 = vperm.slane %v366_v43, 0  ;;  %v369_v50 = vperm.slane %v366_v43, 1 }
  0x47   :  { %551 = vmatpush.bf16.msrb.mxu1 %v835_v53 }
  0x48   :  { %565 = vmatpush.bf16.msrb.mxu2 %v775_v35 }
  0x49   :  { %579 = vmatpush.bf16.msrb.mxu3 %v839_v55 }
  0x4a   :  { %538 = vmatpush.bf16.msrb.mxu0 %v763_v47 }
  0x4b   :  { %552 = vmatpush.bf16.msrb.mxu1 %v827_v1 }
  0x4c   :  { %566 = vmatpush.bf16.msrb.mxu2 %v767_v49 }
  0x4d   :  { %580 = vmatpush.bf16.msrb.mxu3 %v831_v3 }
  0x4e   :  { %539 = vmatpush.bf16.msrb.mxu0 %v755_v59 }
  0x4f   :  { %553 = vmatpush.bf16.msrb.mxu1 %v819_v7 }
  0x50   :  { %567 = vmatpush.bf16.msrb.mxu2 %v759_v61 }
  0x51   :  { %581 = vmatpush.bf16.msrb.mxu3 %v823_v9 }
  0xae   :  { %v275_v12 = vpop.f32.mrf.mxu0 }
  0xaf   :  { %v289_v13 = vpop.f32.mrf.mxu1  ;;  %v276_v14 = vadd.f32 %v275_v12, %v102_v11 }
  0xb1   :  { %v290_v16 = vadd.f32 %v289_v13, %v276_v14 }
  0xb3   :  { %v322_v23 = vmul.f32 0.01, %v290_v16 }
  0xb5   :  { %v326_v27 = vmax.f32 %v290_v16, %v322_v23 }
  0xb6   :  { %v303_v17 = vpop.f32.mrf.mxu2  ;;  %v277_v19 = vpop.f32.mrf.mxu0 }
  0xb7   :  { %v317_v18 = vpop.f32.mrf.mxu3  ;;  %v278_v20 = vadd.f32 %v277_v19, %v102_v11  ;;  %v304_v21 = vadd.f32 %v303_v17, %v103_v15  ;;  %v291_v22 = vpop.f32.mrf.mxu1 }
  0xb9   :  { %v292_v24 = vadd.f32 %v291_v22, %v278_v20  ;;  %v318_v26 = vadd.f32 %v317_v18, %v304_v21 }
  0xbb   :  { %v324_v25 = vmul.f32 0.01, %v292_v24  ;;  %v323_v35 = vmul.f32 0.01, %v318_v26 }
  0xbd   :  { %v328_v29 = vmax.f32 %v292_v24, %v324_v25  ;;  %v327_v40 = vmax.f32 %v318_v26, %v323_v35 }
  0xbe   :  { %v305_v30 = vpop.f32.mrf.mxu2 }
  0xbf   :  { %v306_v31 = vadd.f32 %v305_v30, %v103_v15  ;;  %v319_v33 = vpop.f32.mrf.mxu3  ;;  %v330_v34 = vpack.c.bf16 %v328_v29, %v326_v27 }
  0xc1   :  { %v320_v36 = vadd.f32 %v319_v33, %v306_v31  ;;  %540 = vmatmul.bf16.vlgmr.msrb.gmra.mxu0 %v330_v34  ;;  %568 = vmatmul.bf16.vlgmr.msrb.gmra.mxu2 %v330_v34 }
  0xc3   :  { %v325_v39 = vmul.f32 0.01, %v320_v36 }
  0xc5   :  { %v329_v41 = vmax.f32 %v320_v36, %v325_v39 }
  0xc7   :  { %v331_v42 = vpack.c.bf16 %v329_v41, %v327_v40 }
  0xc9   :  { %554 = vmatmul.bf16.vlgmr.msrb.gmra.mxu1 %v331_v42  ;;  %582 = vmatmul.bf16.vlgmr.msrb.gmra.mxu3 %v331_v42 }
 0x13e   :  { %v541_v44 = vpop.f32.mrf.mxu0 }
 0x13f   :  { %v542_v46 = vadd.f32 %v541_v44, %v368_v45 }
 0x144   :  { %v569_v48 = vpop.f32.mrf.mxu2 }
 0x145   :  { %v570_v54 = vadd.f32 %v569_v48, %v369_v50 }
 0x146   :  { %v555_v47 = vpop.f32.mrf.mxu1  ;;  %v543_v52 = vpop.f32.mrf.mxu0 }
 0x147   :  { %v556_v49 = vadd.f32 %v555_v47, %v542_v46  ;;  %v544_v57 = vadd.f32 %v543_v52, %v368_v45 }
 0x149   :  { %v588_v51 = vmul.f32 0.01, %v556_v49 }
 0x14b   :  { %v592_v53 = vmax.f32 %v556_v49, %v588_v51 }
 0x14c   :  { %v583_v55 = vpop.f32.mrf.mxu3  ;;  %v571_v62 = vpop.f32.mrf.mxu2 }
 0x14d   :  { %v596_v56 = vadd.f32 %v592_v53, %v1098_v28  ;;  %v584_v58 = vadd.f32 %v583_v55, %v570_v54  ;;  %v572_v3 = vadd.f32 %v571_v62, %v369_v50 }
 0x14e   :  { %v557_v59 = vpop.f32.mrf.mxu1 }
 0x14f   :  { %600 = vst [vmem:[#allocation8] sm:$0xff] %v596_v56  ;;  %v589_v60 = vmul.f32 0.01, %v584_v58  ;;  %v558_v61 = vadd.f32 %v557_v59, %v544_v57 }
 0x151   :  { %v593_v63 = vmax.f32 %v584_v58, %v589_v60  ;;  %v590_v0 = vmul.f32 0.01, %v558_v61 }
 0x153   :  { %v597_v1 = vadd.f32 %v593_v63, %v1102_v37  ;;  %v594_v2 = vmax.f32 %v558_v61, %v590_v0 }
 0x154   :  { %v585_v4 = vpop.f32.mrf.mxu3 }
 0x155   :  { %601 = vst [vmem:[#allocation8 + $0x8] sm:$0xff] %v597_v1  ;;  %v598_v5 = vadd.f32 %v594_v2, %v1100_v32  ;;  %v586_v6 = vadd.f32 %v585_v4, %v572_v3 }
 0x157   :  { %602 = vst [vmem:[#allocation8 + $0x10] sm:$0xff] %v598_v5  ;;  %v591_v28 = vmul.f32 0.01, %v586_v6 }
 0x159   :  { %v595_v7 = vmax.f32 %v586_v6, %v591_v28 }
 0x15b   :  { %v599_v8 = vadd.f32 %v595_v7, %v1104_v38 }
 0x15d   :  { %603 = vst [vmem:[#allocation8 + $0x18] sm:$0xff] %v599_v8 }
 0x15e   :  { %616 = dma.vmem_to_hbm [thread:$0]  %s609_s4, 512, %s611_s7, [#allocation4], %s1060_s24, %s1060_s24, %s1061_s25  }
 0x15f   :  { %1054 = dma.done.wait [#allocation4], 512  }
 0x160   :  { %1055 = vsyncadd [#allocation4], 4294966784 }
 0x161   :  { %621 = vsyncpa [#allocation3], 1 }
 0x162   :  { %622 = vsyncpa [#allocation6], 1 }
 0x163   :  { %623 = vsyncpa [#allocation4], 1 }

</bundles_post_ra>
